<compile_context>
chip_gen: v7x
topology: tpu7x:2x2x1
jax: 0.10.0
libtpu: 0.0.40
codegen_flags: <defaults>
</compile_context>

<pallas_src>
import math

import jax
import jax.numpy as jnp
from jax.experimental import pallas as pl
from jax.experimental.pallas import tpu as pltpu


_LANE = 1024        # lane axis: large multiple of 128 -> unmasked, lane-dense stores
_MAX_TILE_R = 512   # (512, 1024) f32 = 2 MiB per block -> ~8 MiB double-buffered


def _round_up(x: int, m: int) -> int:
    return ((x + m - 1) // m) * m


def _whiten_kernel(mean_ref, inv_std_ref, x_ref, o_ref):
    # mean_ref / inv_std_ref: (1, 1) float32 scalars in SMEM.
    m = mean_ref[0, 0]
    inv_std = inv_std_ref[0, 0]
    x = x_ref[...].astype(jnp.float32)
    o_ref[...] = ((x - m) * inv_std).astype(o_ref.dtype)


def data_whiten_layer(x, data_mean, data_std):
    """(x - data_mean) / data_std with scalar mean/std, broadcast over x."""
    orig_shape = x.shape
    orig_dtype = x.dtype
    total = math.prod(orig_shape)

    # Keep scalars in f32 regardless of the tensor dtype; precompute 1/std once.
    mean_arr = jnp.asarray(data_mean, dtype=jnp.float32).reshape(1, 1)
    inv_std_arr = (jnp.float32(1.0)
                   / jnp.asarray(data_std, dtype=jnp.float32)).reshape(1, 1)

    # Lane-dense 2D slab: (rows, _LANE).  Pad the tail so blocks divide evenly.
    rows_raw = pl.cdiv(total, _LANE)
    # Multiple of 32 rows keeps sublane packing aligned for f32/bf16/int8.
    tile_r = min(_MAX_TILE_R, _round_up(rows_raw, 32))
    rows = _round_up(rows_raw, tile_r)
    padded = rows * _LANE

    x_flat = x.reshape(-1)
    if padded != total:
        x_flat = jnp.pad(x_flat, (0, padded - total))
    x2d = x_flat.reshape(rows, _LANE)

    grid = (rows // tile_r,)

    out2d = pl.pallas_call(
        _whiten_kernel,
        out_shape=jax.ShapeDtypeStruct((rows, _LANE), orig_dtype),
        grid=grid,
        in_specs=[
            pl.BlockSpec(memory_space=pltpu.MemorySpace.SMEM),   # mean (f32)
            pl.BlockSpec(memory_space=pltpu.MemorySpace.SMEM),   # 1/std (f32)
            pl.BlockSpec((tile_r, _LANE), lambda i: (i, 0)),     # x tile
        ],
        out_specs=pl.BlockSpec((tile_r, _LANE), lambda i: (i, 0)),
        compiler_params=pltpu.CompilerParams(
            dimension_semantics=("parallel",),
        ),
    )(mean_arr, inv_std_arr, x2d)

    out_flat = out2d.reshape(-1)
    if padded != total:
        out_flat = out_flat[:total]
    return out_flat.reshape(orig_shape)


if __name__ == "__main__":
    key = jax.random.PRNGKey(0)
    # Small NCHW input consistent with the module's image usage.
    x = jax.random.normal(key, (2, 4, 16, 16), dtype=jnp.float32)

    data_mean = 0.1307   # scalar buffer, reshape(1,1,1) in the PyTorch module
    data_std = 0.3081

    out = data_whiten_layer(x, data_mean, data_std)
    out = jax.block_until_ready(out)

    # Reference check against plain JAX.
    ref = (x - data_mean) / data_std
    assert out.shape == x.shape
    assert jnp.allclose(out, ref, atol=1e-5, rtol=1e-5), "mismatch vs reference"

    print("KERNEL_OK")
</pallas_src>

<mosaic_0001>
module attributes {stable_mosaic.version = 11 : i64} {
  func.func @_whiten_kernel(%arg0: i32, %arg1: memref<1x1xf32, #tpu.memory_space<smem>>, %arg2: memref<1x1xf32, #tpu.memory_space<smem>>, %arg3: memref<32x1024xf32, #tpu.memory_space<vmem>>, %arg4: memref<32x1024xf32, #tpu.memory_space<vmem>>) attributes {dimension_semantics = [#tpu.dimension_semantics<parallel>], iteration_bounds = array<i64: 1>, scalar_prefetch = 0 : i64, scratch_operands = 0 : i64, tpu.core_type = #tpu.core_type<tc>, window_params = [{transform_indices = @transform_0, window_bounds = array<i64: 1, 1>}, {transform_indices = @transform_1, window_bounds = array<i64: 1, 1>}, {transform_indices = @transform_2, window_bounds = array<i64: 32, 1024>}, {transform_indices = @transform_3, window_bounds = array<i64: 32, 1024>}]} {
    %c0 = arith.constant 0 : index
    %c0_0 = arith.constant 0 : index
    %0 = memref.load %arg1[%c0, %c0_0] : memref<1x1xf32, #tpu.memory_space<smem>>
    %c0_1 = arith.constant 0 : index
    %c0_2 = arith.constant 0 : index
    %1 = memref.load %arg2[%c0_1, %c0_2] : memref<1x1xf32, #tpu.memory_space<smem>>
    %c0_3 = arith.constant 0 : index
    %c0_4 = arith.constant 0 : index
    %2 = vector.load %arg3[%c0_3, %c0_4] : memref<32x1024xf32, #tpu.memory_space<vmem>>, vector<32x1024xf32>
    %3 = vector.broadcast %0 : f32 to vector<32x1024xf32>
    %4 = arith.subf %2, %3 : vector<32x1024xf32>
    %5 = vector.broadcast %1 : f32 to vector<32x1024xf32>
    %6 = arith.mulf %4, %5 : vector<32x1024xf32>
    %c0_5 = arith.constant 0 : index
    %c0_6 = arith.constant 0 : index
    %7 = vector.load %arg4[%c0_5, %c0_6] : memref<32x1024xf32, #tpu.memory_space<vmem>>, vector<32x1024xf32>
    tpu.vector_store %arg4[%c0_5, %c0_6], %6 {strides = array<i32>} : memref<32x1024xf32, #tpu.memory_space<vmem>>, vector<32x1024xf32>,
    return
  }
  func.func @transform_0(%arg0: i32) -> (i32, i32) {
    %c0_i32 = arith.constant 0 : i32
    %c0_i32_0 = arith.constant 0 : i32
    %c0_i32_1 = arith.constant 0 : i32
    return %c0_i32, %c0_i32_0 : i32, i32
  }
  func.func @transform_1(%arg0: i32) -> (i32, i32) {
    %c0_i32 = arith.constant 0 : i32
    %c0_i32_0 = arith.constant 0 : i32
    %c0_i32_1 = arith.constant 0 : i32
    return %c0_i32, %c0_i32_0 : i32, i32
  }
  func.func @transform_2(%arg0: i32) -> (i32, i32) {
    %c0_i32 = arith.constant 0 : i32
    %c0_i32_0 = arith.constant 0 : i32
    return %arg0, %c0_i32 : i32, i32
  }
  func.func @transform_3(%arg0: i32) -> (i32, i32) {
    %c0_i32 = arith.constant 0 : i32
    %c0_i32_0 = arith.constant 0 : i32
    return %arg0, %c0_i32 : i32, i32
  }
}

</mosaic_0001>

<bundles_post_ra>
// kernel: tpu_custom_call.1
= control target key start
LH: loop header
LB: loop body
LE: loop exit
PB: predicated region body
PF: predicated region fallthrough
CT: control target
= control target key end

     0   :  { %10 = vsyncpa [#allocation5], 0  ;;  %s360_s0 = inlined_call_operand.<no memory space> [shape: f32[1,1], index: 0, kind: input, shape index: {}]   ;;  %s361_s1 = inlined_call_operand.<no memory space> [shape: f32[1,1], index: 1, kind: input, shape index: {}]   ;;  %s362_s2 = inlined_call_operand.hbm [shape: f32[32,1024], index: 2, kind: input, shape index: {}]   ;;  %s363_s3 = inlined_call_operand.hbm [shape: f32[32,1024], index: 3, kind: output, shape index: {}]  }
   0x1   :  { %11 = vsyncpa [#allocation6], 0  ;;  %s232_s12 = smov [#allocation4]   ;;  %s184_s16 = scalar_lea.hbm %s362_s2, 4096 }
   0x2   :  { %s21_s13 = sshll.u32 %s232_s12, 4  ;;  %p185_p0 = scmp.ne.s32.totalorder %s362_s2, %s184_s16  ;;  %s22_s13 = int_to_ptr.vmem [resolvable:$true] %s21_s13 }
   0x3   :  { %p188_p1 = scmp.lt.u32.totalorder %s184_s16, %s362_s2 }
   0x5   :  { %p190_p2 = pnand %p188_p1, %p185_p0 }
   0x7   :  { %193 = shalt.err (!%p190_p2)
}
   0x8   :  { %s194_s21 = scalar_lea.vmem %s22_s13, 4096  ;;  %p199_p4 = scmp.lt.s32.totalorder %s22_s13, %s22_s13 }
   0x9   :  { %p195_p3 = scmp.ne.s32.totalorder %s22_s13, %s194_s21  ;;  %p200_p5 = scmp.lt.s32.totalorder %s194_s21, %s194_s21 }
   0xb   :  { %p201_p6 = por %p200_p5, %p199_p4 }
   0xd   :  { %p202_p7 = pnand %p201_p6, %p195_p3 }
   0xf   :  { %205 = shalt.err (!%p202_p7)
}
  0x10   :  { %s233_s22 = smov 1024   ;;  %s234_s23 = smov 64  }
  0x11   :  { %27 = dma.hbm_to_vmem [thread:$0]  %s362_s2, 4096, %s22_s13, [#allocation5], %s233_s22, %s233_s22, %s234_s23  }
  0x12   :  { %228 = dma.done.wait [#allocation5], 4096  }
  0x13   :  { %229 = vsyncadd [#allocation5], 4294963200  ;;  %v274_v0 = vstv %s360_s0  ;;  %v33_v1 = vld [vmem:[#allocation4] sm:$0xff]  ;;  %v279_v2 = vstv %s361_s1  ;;  %v34_v3 = vld [vmem:[#allocation4 + $0x8] sm:$0xff]  ;;  %s235_s0 = smov [#allocation7]  }
  0x14   :  { %v35_v4 = vld [vmem:[#allocation4 + $0x10] sm:$0xff]  ;;  %v66_v5 = vsub.f32 %v33_v1, %v274_v0  ;;  %v67_v6 = vsub.f32 %v34_v3, %v274_v0  ;;  %v36_v8 = vld [vmem:[#allocation4 + $0x18] sm:$0xff]  ;;  %v37_v9 = vld [vmem:[#allocation4 + $0x20] sm:$0xff]  ;;  %s168_s1 = sshll.u32 %s235_s0, 4  ;;  %s169_s1 = int_to_ptr.vmem [resolvable:$true] %s168_s1 }
  0x15   :  { %v68_v7 = vsub.f32 %v35_v4, %v274_v0  ;;  %v38_v10 = vld [vmem:[#allocation4 + $0x28] sm:$0xff]  ;;  %v69_v11 = vsub.f32 %v36_v8, %v274_v0  ;;  %v70_v12 = vsub.f32 %v37_v9, %v274_v0  ;;  %v39_v14 = vld [vmem:[#allocation4 + $0x30] sm:$0xff]  ;;  %v40_v15 = vld [vmem:[#allocation4 + $0x38] sm:$0xff]  ;;  %s206_s2 = scalar_lea.vmem %s169_s1, 4096  ;;  %p211_p9 = scmp.lt.s32.totalorder %s169_s1, %s169_s1 }
  0x16   :  { %v71_v13 = vsub.f32 %v38_v10, %v274_v0  ;;  %v41_v16 = vld [vmem:[#allocation4 + $0x40] sm:$0xff]  ;;  %v99_v17 = vmul.f32 %v279_v2, %v66_v5  ;;  %v100_v18 = vmul.f32 %v279_v2, %v67_v6  ;;  %v72_v20 = vsub.f32 %v39_v14, %v274_v0  ;;  %v42_v21 = vld [vmem:[#allocation4 + $0x48] sm:$0xff]  ;;  %v43_v22 = vld [vmem:[#allocation4 + $0x50] sm:$0xff]  ;;  %p207_p8 = scmp.ne.s32.totalorder %s169_s1, %s206_s2  ;;  %p212_p10 = scmp.lt.s32.totalorder %s206_s2, %s206_s2 }
  0x17   :  { %v101_v19 = vmul.f32 %v279_v2, %v68_v7  ;;  %v44_v23 = vld [vmem:[#allocation4 + $0x58] sm:$0xff]  ;;  %v102_v24 = vmul.f32 %v279_v2, %v69_v11  ;;  %v103_v25 = vmul.f32 %v279_v2, %v70_v12  ;;  %v73_v27 = vsub.f32 %v40_v15, %v274_v0  ;;  %v45_v28 = vld [vmem:[#allocation4 + $0x60] sm:$0xff]  ;;  %v46_v29 = vld [vmem:[#allocation4 + $0x68] sm:$0xff] }
  0x18   :  { %v104_v26 = vmul.f32 %v279_v2, %v71_v13  ;;  %v47_v30 = vld [vmem:[#allocation4 + $0x70] sm:$0xff]  ;;  %131 = vst [vmem:[#allocation7] sm:$0xff] %v99_v17  ;;  %132 = vst [vmem:[#allocation7 + $0x8] sm:$0xff] %v100_v18  ;;  %v105_v31 = vmul.f32 %v279_v2, %v72_v20  ;;  %v74_v32 = vsub.f32 %v41_v16, %v274_v0  ;;  %v48_v35 = vld [vmem:[#allocation4 + $0x78] sm:$0xff]  ;;  %p213_p11 = por %p212_p10, %p211_p9 }
  0x19   :  { %133 = vst [vmem:[#allocation7 + $0x10] sm:$0xff] %v101_v19  ;;  %v75_v33 = vsub.f32 %v42_v21, %v274_v0  ;;  %v76_v34 = vsub.f32 %v43_v22, %v274_v0  ;;  %134 = vst [vmem:[#allocation7 + $0x18] sm:$0xff] %v102_v24  ;;  %v106_v36 = vmul.f32 %v279_v2, %v73_v27  ;;  %v49_v40 = vld [vmem:[#allocation4 + $0x80] sm:$0xff]  ;;  %v50_v41 = vld [vmem:[#allocation4 + $0x88] sm:$0xff] }
  0x1a   :  { %135 = vst [vmem:[#allocation7 + $0x20] sm:$0xff] %v103_v25  ;;  %136 = vst [vmem:[#allocation7 + $0x28] sm:$0xff] %v104_v26  ;;  %v77_v37 = vsub.f32 %v44_v23, %v274_v0  ;;  %v78_v38 = vsub.f32 %v45_v28, %v274_v0  ;;  %v79_v39 = vsub.f32 %v46_v29, %v274_v0  ;;  %v51_v42 = vld [vmem:[#allocation4 + $0x90] sm:$0xff]  ;;  %v52_v47 = vld [vmem:[#allocation4 + $0x98] sm:$0xff]  ;;  %p214_p12 = pnand %p213_p11, %p207_p8 }
  0x1b   :  { %137 = vst [vmem:[#allocation7 + $0x30] sm:$0xff] %v105_v31  ;;  %v107_v43 = vmul.f32 %v279_v2, %v74_v32  ;;  %v108_v44 = vmul.f32 %v279_v2, %v75_v33  ;;  %v109_v45 = vmul.f32 %v279_v2, %v76_v34  ;;  %v80_v46 = vsub.f32 %v47_v30, %v274_v0  ;;  %v53_v48 = vld [vmem:[#allocation4 + $0xa0] sm:$0xff]  ;;  %v54_v49 = vld [vmem:[#allocation4 + $0xa8] sm:$0xff]  ;;  %v55_v54 = vld [vmem:[#allocation4 + $0xb0] sm:$0xff] }
  0x1c   :  { %138 = vst [vmem:[#allocation7 + $0x38] sm:$0xff] %v106_v36  ;;  %v110_v50 = vmul.f32 %v279_v2, %v77_v37  ;;  %v111_v51 = vmul.f32 %v279_v2, %v78_v38  ;;  %v112_v52 = vmul.f32 %v279_v2, %v79_v39  ;;  %v81_v53 = vsub.f32 %v48_v35, %v274_v0  ;;  %v56_v59 = vld [vmem:[#allocation4 + $0xb8] sm:$0xff]  ;;  %v57_v1 = vld [vmem:[#allocation4 + $0xc0] sm:$0xff]  ;;  %v58_v3 = vld [vmem:[#allocation4 + $0xc8] sm:$0xff] }
  0x1d   :  { %139 = vst [vmem:[#allocation7 + $0x40] sm:$0xff] %v107_v43  ;;  %140 = vst [vmem:[#allocation7 + $0x48] sm:$0xff] %v108_v44  ;;  %v113_v55 = vmul.f32 %v279_v2, %v80_v46  ;;  %v82_v56 = vsub.f32 %v49_v40, %v274_v0  ;;  %v83_v57 = vsub.f32 %v50_v41, %v274_v0  ;;  %v59_v4 = vld [vmem:[#allocation4 + $0xd0] sm:$0xff]  ;;  %v60_v9 = vld [vmem:[#allocation4 + $0xd8] sm:$0xff] }
  0x1e   :  { %141 = vst [vmem:[#allocation7 + $0x50] sm:$0xff] %v109_v45  ;;  %v84_v58 = vsub.f32 %v51_v42, %v274_v0  ;;  %142 = vst [vmem:[#allocation7 + $0x58] sm:$0xff] %v110_v50  ;;  %v114_v60 = vmul.f32 %v279_v2, %v81_v53  ;;  %v85_v61 = vsub.f32 %v52_v47, %v274_v0  ;;  %v61_v10 = vld [vmem:[#allocation4 + $0xe0] sm:$0xff]  ;;  %v62_v11 = vld [vmem:[#allocation4 + $0xe8] sm:$0xff] }
  0x1f   :  { %143 = vst [vmem:[#allocation7 + $0x60] sm:$0xff] %v111_v51  ;;  %144 = vst [vmem:[#allocation7 + $0x68] sm:$0xff] %v112_v52  ;;  %v86_v62 = vsub.f32 %v53_v48, %v274_v0  ;;  %v87_v63 = vsub.f32 %v54_v49, %v274_v0  ;;  %v115_v5 = vmul.f32 %v279_v2, %v82_v56  ;;  %v63_v16 = vld [vmem:[#allocation4 + $0xf0] sm:$0xff]  ;;  %v64_v21 = vld [vmem:[#allocation4 + $0xf8] sm:$0xff] }
  0x20   :  { %145 = vst [vmem:[#allocation7 + $0x70] sm:$0xff] %v113_v55  ;;  %v116_v6 = vmul.f32 %v279_v2, %v83_v57  ;;  %v117_v7 = vmul.f32 %v279_v2, %v84_v58  ;;  %v88_v8 = vsub.f32 %v55_v54, %v274_v0  ;;  %146 = vst [vmem:[#allocation7 + $0x78] sm:$0xff] %v114_v60 }
  0x21   :  { %v118_v12 = vmul.f32 %v279_v2, %v85_v61  ;;  %v119_v13 = vmul.f32 %v279_v2, %v86_v62  ;;  %v120_v14 = vmul.f32 %v279_v2, %v87_v63  ;;  %v89_v15 = vsub.f32 %v56_v59, %v274_v0  ;;  %147 = vst [vmem:[#allocation7 + $0x80] sm:$0xff] %v115_v5 }
  0x22   :  { %148 = vst [vmem:[#allocation7 + $0x88] sm:$0xff] %v116_v6  ;;  %149 = vst [vmem:[#allocation7 + $0x90] sm:$0xff] %v117_v7  ;;  %v121_v17 = vmul.f32 %v279_v2, %v88_v8  ;;  %v90_v18 = vsub.f32 %v57_v1, %v274_v0  ;;  %v91_v19 = vsub.f32 %v58_v3, %v274_v0 }
  0x23   :  { %v92_v20 = vsub.f32 %v59_v4, %v274_v0  ;;  %150 = vst [vmem:[#allocation7 + $0x98] sm:$0xff] %v118_v12  ;;  %151 = vst [vmem:[#allocation7 + $0xa0] sm:$0xff] %v119_v13  ;;  %v122_v22 = vmul.f32 %v279_v2, %v89_v15  ;;  %v93_v23 = vsub.f32 %v60_v9, %v274_v0 }
  0x24   :  { %152 = vst [vmem:[#allocation7 + $0xa8] sm:$0xff] %v120_v14  ;;  %v94_v24 = vsub.f32 %v61_v10, %v274_v0  ;;  %v95_v25 = vsub.f32 %v62_v11, %v274_v0  ;;  %153 = vst [vmem:[#allocation7 + $0xb0] sm:$0xff] %v121_v17  ;;  %v123_v26 = vmul.f32 %v279_v2, %v90_v18 }
  0x25   :  { %v124_v27 = vmul.f32 %v279_v2, %v91_v19  ;;  %v125_v28 = vmul.f32 %v279_v2, %v92_v20  ;;  %v96_v29 = vsub.f32 %v63_v16, %v274_v0  ;;  %154 = vst [vmem:[#allocation7 + $0xb8] sm:$0xff] %v122_v22  ;;  %v126_v30 = vmul.f32 %v279_v2, %v93_v23 }
  0x26   :  { %v127_v31 = vmul.f32 %v279_v2, %v94_v24  ;;  %v128_v32 = vmul.f32 %v279_v2, %v95_v25  ;;  %v97_v33 = vsub.f32 %v64_v21, %v274_v0  ;;  %155 = vst [vmem:[#allocation7 + $0xc0] sm:$0xff] %v123_v26 }
  0x27   :  { %156 = vst [vmem:[#allocation7 + $0xc8] sm:$0xff] %v124_v27  ;;  %157 = vst [vmem:[#allocation7 + $0xd0] sm:$0xff] %v125_v28  ;;  %v129_v34 = vmul.f32 %v279_v2, %v96_v29 }
  0x28   :  { %158 = vst [vmem:[#allocation7 + $0xd8] sm:$0xff] %v126_v30  ;;  %159 = vst [vmem:[#allocation7 + $0xe0] sm:$0xff] %v127_v31  ;;  %v130_v35 = vmul.f32 %v279_v2, %v97_v33 }
  0x29   :  { %160 = vst [vmem:[#allocation7 + $0xe8] sm:$0xff] %v128_v32  ;;  %161 = vst [vmem:[#allocation7 + $0xf0] sm:$0xff] %v129_v34 }
  0x2a   :  { %162 = vst [vmem:[#allocation7 + $0xf8] sm:$0xff] %v130_v35 }
  0x2b   :  { %217 = shalt.err (!%p214_p12)
}
  0x2c   :  { %s218_s5 = scalar_lea.hbm %s363_s3, 4096 }
  0x2d   :  { %p219_p13 = scmp.ne.s32.totalorder %s363_s3, %s218_s5  ;;  %p222_p0 = scmp.lt.u32.totalorder %s218_s5, %s363_s3 }
  0x2f   :  { %p224_p1 = pnand %p222_p0, %p219_p13 }
  0x31   :  { %227 = shalt.err (!%p224_p1)
}
  0x32   :  { %174 = dma.vmem_to_hbm [thread:$0]  %s169_s1, 4096, %s363_s3, [#allocation6], %s233_s22, %s233_s22, %s234_s23  }
  0x33   :  { %230 = dma.done.wait [#allocation6], 4096  }
  0x34   :  { %231 = vsyncadd [#allocation6], 4294963200 }
  0x35   :  { %178 = vsyncpa [#allocation5], 1 }
  0x36   :  { %179 = vsyncpa [#allocation6], 1 }

</bundles_post_ra>
